<compile_context>
chip_gen: v5e
topology: v5e:2x2
jax: 0.10.0
libtpu: 0.0.40
codegen_flags: <defaults>
</compile_context>

<pallas_src>
import jax
import jax.numpy as jnp
from jax.experimental import pallas as pl
from jax.experimental.pallas import tpu as pltpu


def sentence_encoder_kernel(ids_ref, bias_ref, table_hbm, out_ref, rows_vmem, sems):
    """One grid step: DMA-gather tm folded-table rows, add bias, lane-slice max-pool."""
    i = pl.program_id(0)
    tm, H = rows_vmem.shape
    HO = out_ref.shape[-1]
    B = H // HO                      # pool kernel (= batch size)
    V = table_hbm.shape[0]
    base = i * tm

    # Issue one row-gather DMA per token in this block (HBM -> VMEM scratch).
    @pl.loop(0, tm)
    def _issue(r):
        t = ids_ref[base + r]
        t = jnp.minimum(jnp.maximum(t, 0), V - 1)   # clamp out-of-range ids (see notes)
        pltpu.make_async_copy(table_hbm.at[pl.ds(t, 1), :],
                              rows_vmem.at[pl.ds(r, 1), :],
                              sems.at[r]).start()

    # Wait for all row DMAs of this block.
    @pl.loop(0, tm)
    def _wait(r):
        pltpu.make_async_copy(table_hbm.at[pl.ds(0, 1), :],
                              rows_vmem.at[pl.ds(r, 1), :],
                              sems.at[r]).wait()

    # y = gathered (E @ W.T) rows + bias   (bias broadcast along sublanes)
    y = rows_vmem[...] + bias_ref[...]              # (tm, H) f32

    # max_pool1d over the hidden axis with kernel = stride = B.
    # Columns were pre-permuted so pool group j is the contiguous slice
    # [j*HO, (j+1)*HO): the pool reduces to B-1 VPU maxima of lane slices.
    pooled = y[:, 0:HO]
    for j in range(1, B):
        pooled = jnp.maximum(pooled, y[:, j * HO:(j + 1) * HO])
    out_ref[...] = pooled                           # (tm, HO), lane-dense 2-D store


def sentence_encoder_forward(ids, emb_table, w, b, *, tm=None):
    """ids: (B, L) int; emb_table: (V, H); w: (H, H) PyTorch Linear weight; b: (H,)."""
    B, L = ids.shape
    V, H = emb_table.shape
    assert H % B == 0, "max_pool1d kernel (= batch size) must divide hidden_size"
    HO = H // B
    BL = B * L

    # ---- one-time wrapper-side weight prep ----
    # Fold the Linear into the embedding table: M[t] = E[t] @ W.T (row 0 stays zero).
    m = jnp.dot(emb_table.astype(jnp.float32), w.astype(jnp.float32).T)    # (V, H)
    bias = b.astype(jnp.float32).reshape(1, H)
    # Permute columns so pool group j occupies contiguous columns [j*HO, (j+1)*HO):
    # perm[j*HO + m] = m*B + j
    perm = jnp.arange(H, dtype=jnp.int32).reshape(HO, B).T.reshape(-1)
    m_perm = m[:, perm]
    bias_perm = bias[:, perm]

    # ---- row blocking over the flattened (B*L) token axis ----
    if tm is None:
        tm = min(max(BL, 8), 256)
    tm = -(-tm // 8) * 8                       # multiple of 8 sublanes
    n_blocks = -(-BL // tm)
    bl_pad = n_blocks * tm
    ids_flat = ids.reshape(BL).astype(jnp.int32)
    if bl_pad != BL:
        ids_flat = jnp.concatenate([ids_flat,
                                    jnp.zeros((bl_pad - BL,), jnp.int32)])

    out2d = pl.pallas_call(
        sentence_encoder_kernel,
        out_shape=jax.ShapeDtypeStruct((bl_pad, HO), jnp.float32),
        grid_spec=pltpu.PrefetchScalarGridSpec(
            num_scalar_prefetch=1,                 # ids -> SMEM
            grid=(n_blocks,),
            in_specs=[
                pl.BlockSpec((1, H), lambda i, ids: (0, 0)),   # bias, VMEM-resident
                pl.BlockSpec(memory_space=pl.ANY),             # folded table stays in HBM
            ],
            out_specs=pl.BlockSpec((tm, HO), lambda i, ids: (i, 0)),
            scratch_shapes=[
                pltpu.VMEM((tm, H), jnp.float32),              # gathered rows
                pltpu.SemaphoreType.DMA((tm,)),                # one sem per row DMA
            ],
        ),
        compiler_params=pltpu.CompilerParams(
            dimension_semantics=("parallel",)),
    )(ids_flat, bias_perm, m_perm)

    pooled = out2d[:BL].reshape(B, L, HO)          # (B, L, H//B)
    pooled = jnp.transpose(pooled, (1, 0, 2))      # (L, B, H//B)  == transpose(0,1) pooled
    return jnp.squeeze(pooled)                     # mirrors the trailing .squeeze()


def reference_forward(ids, emb_table, w, b):
    x = emb_table[ids]                    # (B, L, H)
    x = x @ w.T + b                       # (B, L, H)
    k = x.shape[0]                        # pool kernel = batch size
    z = jnp.transpose(x, (1, 0, 2))       # (L, B, H)
    L, B, H = z.shape
    pooled = jnp.max(z.reshape(L, B, H // k, k), axis=-1)
    return jnp.squeeze(pooled)


if __name__ == "__main__":
    # config = {hidden_size: 32, vocab_size: 30, max_length: 8}; batch = 2
    hidden_size = 32
    vocab_size = 30
    max_length = 8
    batch = 2
    V = vocab_size + 1

    key = jax.random.PRNGKey(0)
    k_emb, k_w, k_b, k_ids = jax.random.split(key, 4)

    emb_table = jax.random.normal(k_emb, (V, hidden_size), dtype=jnp.float32) * 0.1
    emb_table = emb_table.at[0].set(0.0)  # padding_idx=0 -> zero embedding row
    w = jax.random.normal(k_w, (hidden_size, hidden_size), dtype=jnp.float32) * 0.1
    b = jax.random.normal(k_b, (hidden_size,), dtype=jnp.float32) * 0.1

    ids = jax.random.randint(k_ids, (batch, max_length), 0, V, dtype=jnp.int32)

    out = sentence_encoder_forward(ids, emb_table, w, b)
    out = jax.block_until_ready(out)

    ref = reference_forward(ids, emb_table, w, b)
    assert out.shape == ref.shape, (out.shape, ref.shape)
    err = float(jnp.max(jnp.abs(out - ref)))
    assert jnp.allclose(out, ref, atol=1e-5, rtol=1e-5), err

    print("KERNEL_OK")
</pallas_src>

<mosaic_0001>
module attributes {stable_mosaic.version = 11 : i64} {
  func.func @sentence_encoder_kernel(%arg0: i32, %arg1: memref<16xi32, #tpu.memory_space<smem>>, %arg2: memref<1x32xf32, #tpu.memory_space<vmem>>, %arg3: memref<31x32xf32, #tpu.memory_space<any>>, %arg4: memref<16x16xf32, #tpu.memory_space<vmem>>, %arg5: memref<16x32xf32, #tpu.memory_space<vmem>>, %arg6: memref<16x!tpu.dma_semaphore, #tpu.memory_space<semaphore_mem>>) attributes {dimension_semantics = [#tpu.dimension_semantics<parallel>], iteration_bounds = array<i64: 1>, scalar_prefetch = 1 : i64, scratch_operands = 2 : i64, tpu.core_type = #tpu.core_type<tc>, window_params = [{pipeline_mode = #tpu.pipeline_mode<synchronous>, transform_indices = @transform_0, window_bounds = array<i64: 1, 32>}, {}, {transform_indices = @transform_2, window_bounds = array<i64: 16, 16>}]} {
    %c16_i32 = arith.constant 16 : i32
    %0 = arith.muli %arg0, %c16_i32 : i32
    %c0_i32 = arith.constant 0 : i32
    %c16_i32_0 = arith.constant 16 : i32
    %1 = arith.addi %c0_i32, %c16_i32_0 : i32
    %c1_i32 = arith.constant 1 : i32
    scf.for %arg7 = %c0_i32 to %1 step %c1_i32  : i32 {
      %c1_i32_11 = arith.constant 1 : i32
      %11 = arith.muli %arg7, %c1_i32_11 : i32
      %c0_i32_12 = arith.constant 0 : i32
      %12 = arith.addi %c0_i32_12, %11 : i32
      %13 = arith.addi %0, %12 : i32
      %14 = arith.index_cast %13 : i32 to index
      %15 = memref.load %arg1[%14] : memref<16xi32, #tpu.memory_space<smem>>
      %c0_i32_13 = arith.constant 0 : i32
      %16 = arith.maxsi %15, %c0_i32_13 : i32
      %c30_i32 = arith.constant 30 : i32
      %17 = arith.minsi %16, %c30_i32 : i32
      %c0_i32_14 = arith.constant 0 : i32
      %18 = tpu.memref_slice %arg3[%17, %c0_i32_14] : memref<31x32xf32, #tpu.memory_space<any>> -> memref<1x32xf32, #tpu.memory_space<any>>
      %c0_i32_15 = arith.constant 0 : i32
      %19 = tpu.memref_slice %arg5[%12, %c0_i32_15] : memref<16x32xf32, #tpu.memory_space<vmem>> -> memref<1x32xf32, #tpu.memory_space<vmem>>
      %20 = tpu.memref_slice %arg6[%12] : memref<16x!tpu.dma_semaphore, #tpu.memory_space<semaphore_mem>> -> memref<1x!tpu.dma_semaphore, #tpu.memory_space<semaphore_mem>>
      %21 = tpu.memref_squeeze %20 : memref<1x!tpu.dma_semaphore, #tpu.memory_space<semaphore_mem>> -> memref<!tpu.dma_semaphore, #tpu.memory_space<semaphore_mem>>
      tpu.enqueue_dma source(%18 : memref<1x32xf32, #tpu.memory_space<any>>) target(%19 : memref<1x32xf32, #tpu.memory_space<vmem>>) target_semaphore(%21 : memref<!tpu.dma_semaphore, #tpu.memory_space<semaphore_mem>>)
    }
    %c16_i32_1 = arith.constant 16 : i32
    %c0_i32_2 = arith.constant 0 : i32
    %c16_i32_3 = arith.constant 16 : i32
    %2 = arith.addi %c0_i32_2, %c16_i32_3 : i32
    %c1_i32_4 = arith.constant 1 : i32
    scf.for %arg7 = %c0_i32_2 to %2 step %c1_i32_4  : i32 {
      %c1_i32_11 = arith.constant 1 : i32
      %11 = arith.muli %arg7, %c1_i32_11 : i32
      %c0_i32_12 = arith.constant 0 : i32
      %12 = arith.addi %c0_i32_12, %11 : i32
      %c0_i32_13 = arith.constant 0 : i32
      %c0_i32_14 = arith.constant 0 : i32
      %13 = tpu.memref_slice %arg3[%c0_i32_13, %c0_i32_14] : memref<31x32xf32, #tpu.memory_space<any>> -> memref<1x32xf32, #tpu.memory_space<any>>
      %c0_i32_15 = arith.constant 0 : i32
      %14 = tpu.memref_slice %arg5[%12, %c0_i32_15] : memref<16x32xf32, #tpu.memory_space<vmem>> -> memref<1x32xf32, #tpu.memory_space<vmem>>
      %15 = tpu.memref_slice %arg6[%12] : memref<16x!tpu.dma_semaphore, #tpu.memory_space<semaphore_mem>> -> memref<1x!tpu.dma_semaphore, #tpu.memory_space<semaphore_mem>>
      %16 = tpu.memref_squeeze %15 : memref<1x!tpu.dma_semaphore, #tpu.memory_space<semaphore_mem>> -> memref<!tpu.dma_semaphore, #tpu.memory_space<semaphore_mem>>
      tpu.wait_dma2 semaphore(%16 : memref<!tpu.dma_semaphore, #tpu.memory_space<semaphore_mem>>) src(%13 : memref<1x32xf32, #tpu.memory_space<any>>) dst(%14 : memref<1x32xf32, #tpu.memory_space<vmem>>)
    }
    %c16_i32_5 = arith.constant 16 : i32
    %c0 = arith.constant 0 : index
    %c0_6 = arith.constant 0 : index
    %3 = vector.load %arg5[%c0, %c0_6] : memref<16x32xf32, #tpu.memory_space<vmem>>, vector<16x32xf32>
    %c0_7 = arith.constant 0 : index
    %c0_8 = arith.constant 0 : index
    %4 = vector.load %arg2[%c0_7, %c0_8] : memref<1x32xf32, #tpu.memory_space<vmem>>, vector<1x32xf32>
    %5 = vector.broadcast %4 : vector<1x32xf32> to vector<16x32xf32>
    %6 = arith.addf %3, %5 : vector<16x32xf32>
    %7 = vector.extract_strided_slice %6 {offsets = [0, 0], sizes = [16, 16], strides = [1, 1]} : vector<16x32xf32> to vector<16x16xf32>
    %8 = vector.extract_strided_slice %6 {offsets = [0, 16], sizes = [16, 16], strides = [1, 1]} : vector<16x32xf32> to vector<16x16xf32>
    %9 = arith.maximumf %7, %8 : vector<16x16xf32>
    %c0_9 = arith.constant 0 : index
    %c0_10 = arith.constant 0 : index
    %10 = vector.load %arg4[%c0_9, %c0_10] : memref<16x16xf32, #tpu.memory_space<vmem>>, vector<16x16xf32>
    tpu.vector_store %arg4[%c0_9, %c0_10], %9 {strides = array<i32>} : memref<16x16xf32, #tpu.memory_space<vmem>>, vector<16x16xf32>,
    return
  }
  func.func @transform_0(%arg0: i32, %arg1: memref<16xi32, #tpu.memory_space<smem>>) -> (i32, i32) {
    %c0_i32 = arith.constant 0 : i32
    %c0_i32_0 = arith.constant 0 : i32
    %c0_i32_1 = arith.constant 0 : i32
    return %c0_i32, %c0_i32_0 : i32, i32
  }
  func.func @transform_2(%arg0: i32, %arg1: memref<16xi32, #tpu.memory_space<smem>>) -> (i32, i32) {
    %c0_i32 = arith.constant 0 : i32
    %c0_i32_0 = arith.constant 0 : i32
    return %arg0, %c0_i32 : i32, i32
  }
}

</mosaic_0001>

<bundles_post_ra>
// kernel: tpu_custom_call.1
= control target key start
LH: loop header
LB: loop body
LE: loop exit
PB: predicated region body
PF: predicated region fallthrough
CT: control target
= control target key end

     0   :  { %s391_s15 = smov [#allocation5]   ;;  %s450_s0 = inlined_call_operand.hbm [shape: s32[16], index: 0, kind: input, shape index: {}]   ;;  %s451_s1 = inlined_call_operand.hbm [shape: f32[1,32], index: 1, kind: input, shape index: {}]   ;;  %s452_s2 = inlined_call_operand.hbm [shape: f32[31,32], index: 2, kind: input, shape index: {}]   ;;  %s453_s3 = inlined_call_operand.hbm [shape: f32[16,16], index: 3, kind: output, shape index: {}]  }
   0x1   :  { %s9_s14 = sshll.u32 %s450_s0, 4  ;;  %s10_s14 = int_to_ptr.hbm [resolvable:$true] %s9_s14 }
   0x2   :  { %12 = dma.hbm_to_smem %s10_s14, 16, %s391_s15, [#allocation4] }
   0x3   :  { %375 = dma.done.wait [#allocation4], 16 }
   0x4   :  { %376 = vsyncadd [#allocation4], 4294967280 }
   0x5   :  { %15 = sfence }
   0x6   :  { %16 = vsyncpa [#allocation7], 0 }
   0x7   :  { %17 = vsyncpa [#allocation8], 0  ;;  %s23_s18 = sshll.u32 %s451_s1, 4  ;;  %s392_s19 = smov [#allocation6]   ;;  %s24_s18 = int_to_ptr.hbm [resolvable:$true] %s23_s18 }
   0x8   :  { %s25_s20 = sshll.u32 %s392_s19, 4  ;;  %s26_s20 = int_to_ptr.vmem [resolvable:$true] %s25_s20 }
   0x9   :  { %28 = dma.hbm_to_vmem [thread:$0]  %s24_s18, 16, %s26_s20, [#allocation7]  }
   0xa   :  { %377 = dma.done.wait [#allocation7], 16  }
   0xb   :  { %378 = vsyncadd [#allocation7], 4294967280  ;;  %s424_s0 = smov 0  }
   0xc LB: > { %s41_s21 = sld [smem:[#allocation5 + %s385_s0]]  ;;  %s47_s1 = scalar_lea.vmem [#allocation2], %s385_s0  ;;  %s385_s0 = sphi %s424_s0, %s39_s0  }
   0xd   : > { %s431_s22 = sshll.u32 %s47_s1, 4  ;;  %s48_s27 = scalar_lea.sflag [#allocation3], %s385_s0  ;;  %s59_s22 = int_to_ptr.vmem [resolvable:$true] %s431_s22 }
   0xe   : > { %s323_s5 = scalar_lea.hbm %s452_s2, 32 }
  0x12   : > { %p42_p0 = scmp.gt.s32.totalorder %s41_s21, 0  ;;  %p237_p1 = scmp.lt.s32.totalorder %s41_s21, 30 }
  0x14   : > { %s455_s21 = smov (!%p42_p0, %s41_s21), 0 }
  0x15   : > { %s457_s21 = smov (!%p237_p1, %s455_s21), 30 }
  0x16   : > { %s46_s25 = scalar_lea.hbm %s452_s2, %s457_s21 }
  0x17   : > { %s56_s26 = sshll.u32 %s46_s25, 4  ;;  %s57_s26 = int_to_ptr.hbm [resolvable:$true] %s56_s26 }
  0x18   : > { %s319_s28 = sshra.s32 %s57_s26, 4  ;;  %s320_s28 = int_to_ptr.hbm [resolvable:$true] %s319_s28 }
  0x19   : > { %s321_s29 = scalar_lea.hbm %s320_s28, 1  ;;  %p324_p3 = scmp.lt.s32.totalorder %s320_s28, %s452_s2 }
  0x1a   : > { %p322_p2 = scmp.ne.s32.totalorder %s320_s28, %s321_s29  ;;  %p325_p4 = scmp.lt.s32.totalorder %s323_s5, %s321_s29 }
  0x1c   : > { %p326_p5 = por %p325_p4, %p324_p3 }
  0x1e   : > { %p327_p6 = pnand %p326_p5, %p322_p2 }
  0x20   : > { %330 = shalt.err (!%p327_p6)  }
  0x21   : > { %s331_s8 = sshra.s32 %s59_s22, 4  ;;  %s393_s10 = smov [#allocation2]   ;;  %s332_s8 = int_to_ptr.vmem [resolvable:$true] %s331_s8 }
  0x22   : > { %s333_s9 = scalar_lea.vmem %s332_s8, 1  ;;  %s335_s11 = scalar_lea.vmem %s393_s10, 16 }
  0x23   : > { %p334_p7 = scmp.ne.s32.totalorder %s332_s8, %s333_s9  ;;  %p336_p8 = scmp.lt.s32.totalorder %s332_s8, [#allocation2] }
  0x24   : > { %p337_p9 = scmp.lt.s32.totalorder %s335_s11, %s333_s9 }
  0x26   : > { %p338_p10 = por %p337_p9, %p336_p8 }
  0x28   : > { %p339_p11 = pnand %p338_p10, %p334_p7 }
  0x2a   : > { %342 = shalt.err (!%p339_p11)  }
  0x2b   : > { %61 = dma.hbm_to_vmem [thread:$0]  %s57_s26, 16, %s59_s22, %s48_s27 }
  0x2c   : > { %s39_s0 = sadd.s32 1, %s385_s0  }
  0x2d   : > { %p36_p12 = scmp.ge.s32.totalorder %s39_s0, 16  }
  0x2e   :  { %s387_s12 = smov (%p36_p12), 0  }
  0x2f   :  { %38 = sbr.rel (!%p36_p12) target bundleno = 12 (0xc), region = 65 }
  0x34 LB: > { %s68_s13 = scalar_lea.sflag [#allocation3], %s389_s12  ;;  %s389_s12 = sphi %s387_s12, %s67_s12  }
  0x35   : > { %379 = dma.done.wait %s68_s13, 16 }
  0x36   : > { %380 = vsyncadd %s68_s13, 4294967280  ;;  %s67_s12 = sadd.s32 1, %s389_s12  }
  0x37   : > { %p64_p13 = scmp.ge.s32.totalorder %s67_s12, 16  }
  0x38   :  { %v72_v0 = vld [vmem:[#allocation2] sm:$0xff] (%p64_p13)  ;;  %v282_v1 = vld [vmem:[#allocation6] ss:$0 sm:$0xff] (%p64_p13)  ;;  %s394_s14 = smov (%p64_p13), 112   ;;  %v73_v3 = vld [vmem:[#allocation2 + $0x8] sm:$0xff] (%p64_p13)  ;;  %vm90_vm0 = vcmask (%p64_p13), 130048  }
  0x39   :  { %66 = sbr.rel (!%p64_p13) target bundleno = 52 (0x34), region = 76  ;;  %v78_v2 = vadd.f32 (%p64_p13), %v282_v1, %v72_v0  ;;  %v79_v4 = vadd.f32 (%p64_p13), %v282_v1, %v73_v3  ;;  %s395_s2 = smov (%p64_p13), [#allocation9]  }
  0x3a   :  { %s97_s15 = sshll.u32 (%p64_p13), %s395_s2, 4  ;;  %s99_s18 = sshll.u32 (%p64_p13), %s453_s3, 4  ;;  %s98_s15 = int_to_ptr.vmem [resolvable:$true] %s97_s15  ;;  %s100_s18 = int_to_ptr.hbm [resolvable:$true] %s99_s18 }
  0x3b   :  { %82 = vrot.lane.b32.xlu0 (%p64_p13), %v78_v2, %s394_s14  ;;  %s396_s19 = smov (%p64_p13), 128   ;;  %s397_s20 = smov (%p64_p13), 8  }
  0x43   :  { %84 = vrot.lane.b32.xlu0 %v79_v4, %s394_s14 }
  0xad   :  { %v83_v5 = vpop.permute.xlu0 %82 }
  0xae   :  { %v88_v6 = vmax.f32 %v78_v2, %v83_v5 }
  0xb0   :  { %91 = vst.msk [vmem:[#allocation9] sm:$0xff] %vm90_vm0, %v88_v6 }
  0xb5   :  { %v85_v7 = vpop.permute.xlu0 %84 }
  0xb6   :  { %v89_v8 = vmax.f32 %v79_v4, %v85_v7 }
  0xb8   :  { %92 = vst.msk [vmem:[#allocation9 + $0x8] sm:$0xff] %vm90_vm0, %v89_v8 }
  0xb9   :  { %105 = dma.vmem_to_hbm [thread:$0]  %s98_s15, 256, %s100_s18, [#allocation8], %s396_s19, %s396_s19, %s397_s20  }
  0xba   :  { %381 = dma.done.wait [#allocation8], 256  }
  0xbb   :  { %382 = vsyncadd [#allocation8], 4294967040 }
  0xbc   :  { %110 = vsyncpa [#allocation7], 1 }
  0xbd   :  { %111 = vsyncpa [#allocation8], 1 }
  0xbe   :  { %112 = vsyncmov [#allocation3] }
  0xc1   :  { %s113_s0 = vpop.sfrf %112 }
  0xc2   :  { %p242_p0 = scmp.ne.s32.totalorder %s113_s0, 0 }
  0xc4   :  { %117 = shalt.err (%p242_p0)  }
  0xc5   :  { %119 = vsyncmov [#allocation3 + $0x1] }
  0xc8   :  { %s120_s21 = vpop.sfrf %119 }
  0xc9   :  { %p243_p1 = scmp.ne.s32.totalorder %s120_s21, 0 }
  0xcb   :  { %124 = shalt.err (%p243_p1)  }
  0xcc   :  { %126 = vsyncmov [#allocation3 + $0x2] }
  0xcf   :  { %s127_s3 = vpop.sfrf %126 }
  0xd0   :  { %p244_p2 = scmp.ne.s32.totalorder %s127_s3, 0 }
  0xd2   :  { %131 = shalt.err (%p244_p2)  }
  0xd3   :  { %133 = vsyncmov [#allocation3 + $0x3] }
  0xd6   :  { %s134_s1 = vpop.sfrf %133 }
  0xd7   :  { %p245_p3 = scmp.ne.s32.totalorder %s134_s1, 0 }
  0xd9   :  { %138 = shalt.err (%p245_p3)  }
  0xda   :  { %140 = vsyncmov [#allocation3 + $0x4] }
  0xdd   :  { %s141_s22 = vpop.sfrf %140 }
  0xde   :  { %p246_p4 = scmp.ne.s32.totalorder %s141_s22, 0 }
  0xe0   :  { %145 = shalt.err (%p246_p4)  }
  0xe1   :  { %147 = vsyncmov [#allocation3 + $0x5] }
  0xe4   :  { %s148_s23 = vpop.sfrf %147 }
  0xe5   :  { %p247_p5 = scmp.ne.s32.totalorder %s148_s23, 0 }
  0xe7   :  { %152 = shalt.err (%p247_p5)  }
  0xe8   :  { %154 = vsyncmov [#allocation3 + $0x6] }
  0xeb   :  { %s155_s24 = vpop.sfrf %154 }
  0xec   :  { %p248_p6 = scmp.ne.s32.totalorder %s155_s24, 0 }
  0xee   :  { %159 = shalt.err (%p248_p6)  }
  0xef   :  { %161 = vsyncmov [#allocation3 + $0x7] }
  0xf2   :  { %s162_s25 = vpop.sfrf %161 }
  0xf3   :  { %p249_p7 = scmp.ne.s32.totalorder %s162_s25, 0 }
  0xf5   :  { %166 = shalt.err (%p249_p7)  }
  0xf6   :  { %168 = vsyncmov [#allocation3 + $0x8] }
  0xf9   :  { %s169_s26 = vpop.sfrf %168 }
  0xfa   :  { %p250_p8 = scmp.ne.s32.totalorder %s169_s26, 0 }
  0xfc   :  { %173 = shalt.err (%p250_p8)  }
  0xfd   :  { %175 = vsyncmov [#allocation3 + $0x9] }
 0x100   :  { %s176_s27 = vpop.sfrf %175 }
 0x101   :  { %p251_p9 = scmp.ne.s32.totalorder %s176_s27, 0 }
 0x103   :  { %180 = shalt.err (%p251_p9)  }
 0x104   :  { %182 = vsyncmov [#allocation3 + $0xa] }
 0x107   :  { %s183_s28 = vpop.sfrf %182 }
 0x108   :  { %p252_p10 = scmp.ne.s32.totalorder %s183_s28, 0 }
 0x10a   :  { %187 = shalt.err (%p252_p10)  }
 0x10b   :  { %189 = vsyncmov [#allocation3 + $0xb] }
 0x10e   :  { %s190_s29 = vpop.sfrf %189 }
 0x10f   :  { %p253_p11 = scmp.ne.s32.totalorder %s190_s29, 0 }
 0x111   :  { %194 = shalt.err (%p253_p11)  }
 0x112   :  { %196 = vsyncmov [#allocation3 + $0xc] }
 0x115   :  { %s197_s30 = vpop.sfrf %196 }
 0x116   :  { %p254_p12 = scmp.ne.s32.totalorder %s197_s30, 0 }
 0x118   :  { %201 = shalt.err (%p254_p12)  }
 0x119   :  { %203 = vsyncmov [#allocation3 + $0xd] }
 0x11c   :  { %s204_s4 = vpop.sfrf %203 }
 0x11d   :  { %p255_p13 = scmp.ne.s32.totalorder %s204_s4, 0 }
 0x11f   :  { %208 = shalt.err (%p255_p13)  }
 0x120   :  { %210 = vsyncmov [#allocation3 + $0xe] }
 0x123   :  { %s211_s5 = vpop.sfrf %210 }
 0x124   :  { %p256_p0 = scmp.ne.s32.totalorder %s211_s5, 0 }
 0x126   :  { %215 = shalt.err (%p256_p0)  }
 0x127   :  { %217 = vsyncmov [#allocation3 + $0xf] }
 0x12a   :  { %s218_s6 = vpop.sfrf %217 }
 0x12b   :  { %p257_p1 = scmp.ne.s32.totalorder %s218_s6, 0 }
 0x12d   :  { %222 = shalt.err (%p257_p1)  }

</bundles_post_ra>
